<compile_context>
chip_gen: v7x
topology: tpu7x:2x2x1
jax: 0.10.0
libtpu: 0.0.40
codegen_flags: <defaults>
</compile_context>

<pallas_src>
import functools

import jax
import jax.numpy as jnp
from jax.experimental import pallas as pl
from jax.experimental.pallas import tpu as pltpu


# ------------------------------ Pallas kernel ------------------------------

def _sru_kernel(x_ref, gamma_ref, beta_ref, wg_ref, o_ref, *,
                inv_nm1, eps, gate):
    """Fused GroupNorm + sigmoid gate + reconstruct for a (TB, G, L) block.

    x_ref:     (TB, G, L)  activations, one row per (batch, group)
    gamma_ref: (1,  G, L)  per-channel gamma broadcast to the group layout
    beta_ref:  (1,  G, L)  per-channel beta,  broadcast likewise
    wg_ref:    (1,  G, L)  gamma / sum(gamma), broadcast likewise
    o_ref:     (TB, G, L)  output
    """
    x = x_ref[...]                                         # (TB, G, L) f32

    # --- GroupBatchnorm2d: per-(batch, group) mean / unbiased std over L ---
    mean = jnp.mean(x, axis=-1, keepdims=True)             # (TB, G, 1)
    d = x - mean
    var = jnp.sum(d * d, axis=-1, keepdims=True) * inv_nm1  # Bessel (n-1)
    inv_std = 1.0 / (jnp.sqrt(var) + eps)                  # tiny (TB, G, 1)
    gn = d * inv_std * gamma_ref[...] + beta_ref[...]

    # --- gating: sigmoid(gn * w_gamma) >= gate -> informative ---
    rw = 1.0 / (1.0 + jnp.exp(-(gn * wg_ref[...])))        # exp on EUP
    x1 = jnp.where(rw >= gate, x, 0.0)                     # info_mask * x
    x2 = x - x1                                            # noninfo_mask * x (exact)

    # --- reconstruct: out[:, :C/2] = x1[:, :C/2] + x2[:, C/2:] and vice versa.
    # C/2 channels == G/2 group rows (G even), so the swap is a sublane-aligned
    # half rotation of the group axis; stores stay full-lane (512) unmasked.
    g2 = x_ref.shape[1] // 2
    o_ref[:, :g2, :] = x1[:, :g2, :] + x2[:, g2:, :]
    o_ref[:, g2:, :] = x1[:, g2:, :] + x2[:, :g2, :]


# -------------------------------- wrapper -----------------------------------

def sru_forward(x, gamma, beta, *, group_num=16, gate_threshold=0.5,
                eps=1e-10, max_block_bytes=2 << 20):
    """SRU forward.  x: (N, C, H, W) float32; gamma, beta: (C,)."""
    N, C, H, W = x.shape
    G = group_num
    assert C % G == 0, "channel count must be a multiple of group_num"
    assert G % 2 == 0, "group_num must be even for the group-row half swap"
    # TODO(synk): general (C % G != 0 or odd G) layouts need a per-channel
    # reconstruct instead of the group-row half rotation used here.
    Cg = C // G
    L = Cg * H * W

    xg = x.reshape(N, G, L).astype(jnp.float32)

    # Per-channel params laid out to match row g = channels [g*Cg, (g+1)*Cg),
    # each channel occupying H*W consecutive lanes.  Fetched into VMEM once
    # (constant index map) and reused for every grid step.
    def to_grouped(p):
        p = p.astype(jnp.float32).reshape(G, Cg, 1)
        return jnp.broadcast_to(p, (G, Cg, H * W)).reshape(1, G, L)

    gamma_g = to_grouped(gamma)
    beta_g = to_grouped(beta)
    wg_g = to_grouped(gamma / jnp.sum(gamma))

    # Batch tile: as many batch rows per grid step as fit the block budget
    # (fewer grid steps -> less fixed per-step overhead), while still dividing
    # N so the remaining axis can be sharded across v7x's two TensorCores.
    per_batch = G * L * 4
    tb = N
    while tb > 1 and (tb * per_batch > max_block_bytes or N % tb != 0):
        tb -= 1

    kernel = functools.partial(
        _sru_kernel, inv_nm1=1.0 / (L - 1), eps=eps, gate=gate_threshold)

    out = pl.pallas_call(
        kernel,
        out_shape=jax.ShapeDtypeStruct((N, G, L), jnp.float32),
        grid=(N // tb,),
        in_specs=[
            pl.BlockSpec((tb, G, L), lambda b: (b, 0, 0)),
            pl.BlockSpec((1, G, L), lambda b: (0, 0, 0)),
            pl.BlockSpec((1, G, L), lambda b: (0, 0, 0)),
            pl.BlockSpec((1, G, L), lambda b: (0, 0, 0)),
        ],
        out_specs=pl.BlockSpec((tb, G, L), lambda b: (b, 0, 0)),
        compiler_params=pltpu.CompilerParams(
            dimension_semantics=("parallel",)),
    )(xg, gamma_g, beta_g, wg_g)

    return out.reshape(N, C, H, W).astype(x.dtype)


# ------------------------ pure-JAX reference (check) -------------------------

def sru_reference(x, gamma, beta, group_num, gate_threshold, eps):
    N, C, H, W = x.shape
    xg = x.reshape(N, group_num, -1)
    mean = jnp.mean(xg, axis=2, keepdims=True)
    std = jnp.std(xg, axis=2, keepdims=True, ddof=1)        # torch.std: unbiased
    gn = ((xg - mean) / (std + eps)).reshape(N, C, H, W)
    gn = gn * gamma[None, :, None, None] + beta[None, :, None, None]
    w_gamma = gamma / jnp.sum(gamma)
    rw = 1.0 / (1.0 + jnp.exp(-(gn * w_gamma[None, :, None, None])))
    info = rw >= gate_threshold
    x1 = jnp.where(info, x, 0.0)
    x2 = jnp.where(info, 0.0, x)
    half = C // 2
    out = jnp.concatenate(
        [x1[:, :half] + x2[:, half:], x1[:, half:] + x2[:, :half]], axis=1)
    return out, rw


# ---------------------------------- main -------------------------------------

if __name__ == "__main__":
    N, C, H, W = 2, 32, 16, 16          # SRU default group_num=16 needs C>=16
    group_num, gate_threshold, eps = 16, 0.5, 1e-10

    key = jax.random.PRNGKey(0)
    kx, kg, kb = jax.random.split(key, 3)
    x = jax.random.normal(kx, (N, C, H, W), jnp.float32)    # NCHW, like torch
    gamma = jax.random.normal(kg, (C,), jnp.float32)        # torch: randn init
    beta = 0.1 * jax.random.normal(kb, (C,), jnp.float32)   # learnable param

    out = sru_forward(x, gamma, beta, group_num=group_num,
                      gate_threshold=gate_threshold, eps=eps)
    out = jax.block_until_ready(out)
    assert out.shape == (N, C, H, W)

    ref, rw_ref = sru_reference(x, gamma, beta, group_num, gate_threshold, eps)
    diff = jnp.abs(out - ref)
    # Outputs are exact copies/sums of masked inputs, so kernel and reference
    # can only differ where the gate value sits numerically AT the 0.5
    # threshold (fp reduction-order in the group stats).  Exclude that
    # measure-zero band from the check.
    near = jnp.abs(rw_ref - gate_threshold) < 1e-4
    half = C // 2
    near_pair = jnp.concatenate([near[:, half:], near[:, :half]], axis=1)
    ok = jnp.where(near | near_pair, True, diff < 1e-3)
    assert bool(jnp.all(ok)), f"mismatch vs reference: {float(jnp.max(diff))}"

    print("KERNEL_OK")
</pallas_src>

<mosaic_0001>
module attributes {stable_mosaic.version = 11 : i64} {
  func.func @_sru_kernel(%arg0: i32, %arg1: memref<2x16x512xf32, #tpu.memory_space<vmem>>, %arg2: memref<1x16x512xf32, #tpu.memory_space<vmem>>, %arg3: memref<1x16x512xf32, #tpu.memory_space<vmem>>, %arg4: memref<1x16x512xf32, #tpu.memory_space<vmem>>, %arg5: memref<2x16x512xf32, #tpu.memory_space<vmem>>) attributes {dimension_semantics = [#tpu.dimension_semantics<parallel>], iteration_bounds = array<i64: 1>, scalar_prefetch = 0 : i64, scratch_operands = 0 : i64, tpu.core_type = #tpu.core_type<tc>, window_params = [{transform_indices = @transform_0, window_bounds = array<i64: 2, 16, 512>}, {pipeline_mode = #tpu.pipeline_mode<synchronous>, transform_indices = @transform_1, window_bounds = array<i64: 1, 16, 512>}, {pipeline_mode = #tpu.pipeline_mode<synchronous>, transform_indices = @transform_2, window_bounds = array<i64: 1, 16, 512>}, {pipeline_mode = #tpu.pipeline_mode<synchronous>, transform_indices = @transform_3, window_bounds = array<i64: 1, 16, 512>}, {transform_indices = @transform_4, window_bounds = array<i64: 2, 16, 512>}]} {
    %c0 = arith.constant 0 : index
    %c0_0 = arith.constant 0 : index
    %c0_1 = arith.constant 0 : index
    %0 = vector.load %arg1[%c0, %c0_0, %c0_1] : memref<2x16x512xf32, #tpu.memory_space<vmem>>, vector<2x16x512xf32>
    %cst = arith.constant dense<0.000000e+00> : vector<2x16xf32>
    %1 = vector.multi_reduction <add>, %0, %cst [2] : vector<2x16x512xf32> to vector<2x16xf32>
    %2 = vector.shape_cast %1 : vector<2x16xf32> to vector<2x16x1xf32>
    %cst_2 = arith.constant 5.120000e+02 : f32
    %3 = vector.broadcast %cst_2 : f32 to vector<2x16x1xf32>
    %4 = arith.divf %2, %3 : vector<2x16x1xf32>
    %5 = vector.broadcast %4 : vector<2x16x1xf32> to vector<2x16x512xf32>
    %6 = arith.subf %0, %5 : vector<2x16x512xf32>
    %7 = arith.mulf %6, %6 : vector<2x16x512xf32>
    %cst_3 = arith.constant dense<0.000000e+00> : vector<2x16xf32>
    %8 = vector.multi_reduction <add>, %7, %cst_3 [2] : vector<2x16x512xf32> to vector<2x16xf32>
    %9 = vector.shape_cast %8 : vector<2x16xf32> to vector<2x16x1xf32>
    %cst_4 = arith.constant 0.00195694715 : f32
    %10 = vector.broadcast %cst_4 : f32 to vector<2x16x1xf32>
    %11 = arith.mulf %9, %10 : vector<2x16x1xf32>
    %12 = math.sqrt %11 : vector<2x16x1xf32>
    %cst_5 = arith.constant 1.000000e-10 : f32
    %13 = vector.broadcast %cst_5 : f32 to vector<2x16x1xf32>
    %14 = arith.addf %12, %13 : vector<2x16x1xf32>
    %cst_6 = arith.constant 1.000000e+00 : f32
    %15 = vector.broadcast %cst_6 : f32 to vector<2x16x1xf32>
    %16 = arith.divf %15, %14 : vector<2x16x1xf32>
    %17 = vector.broadcast %16 : vector<2x16x1xf32> to vector<2x16x512xf32>
    %18 = arith.mulf %6, %17 : vector<2x16x512xf32>
    %c0_7 = arith.constant 0 : index
    %c0_8 = arith.constant 0 : index
    %c0_9 = arith.constant 0 : index
    %19 = vector.load %arg2[%c0_7, %c0_8, %c0_9] : memref<1x16x512xf32, #tpu.memory_space<vmem>>, vector<1x16x512xf32>
    %20 = vector.broadcast %19 : vector<1x16x512xf32> to vector<2x16x512xf32>
    %21 = arith.mulf %18, %20 : vector<2x16x512xf32>
    %c0_10 = arith.constant 0 : index
    %c0_11 = arith.constant 0 : index
    %c0_12 = arith.constant 0 : index
    %22 = vector.load %arg3[%c0_10, %c0_11, %c0_12] : memref<1x16x512xf32, #tpu.memory_space<vmem>>, vector<1x16x512xf32>
    %23 = vector.broadcast %22 : vector<1x16x512xf32> to vector<2x16x512xf32>
    %24 = arith.addf %21, %23 : vector<2x16x512xf32>
    %c0_13 = arith.constant 0 : index
    %c0_14 = arith.constant 0 : index
    %c0_15 = arith.constant 0 : index
    %25 = vector.load %arg4[%c0_13, %c0_14, %c0_15] : memref<1x16x512xf32, #tpu.memory_space<vmem>>, vector<1x16x512xf32>
    %26 = vector.broadcast %25 : vector<1x16x512xf32> to vector<2x16x512xf32>
    %27 = arith.mulf %24, %26 : vector<2x16x512xf32>
    %cst_16 = arith.constant 0.000000e+00 : f32
    %28 = vector.broadcast %cst_16 : f32 to vector<2x16x512xf32>
    %29 = arith.subf %28, %27 : vector<2x16x512xf32>
    %30 = math.exp %29 : vector<2x16x512xf32>
    %cst_17 = arith.constant 1.000000e+00 : f32
    %31 = vector.broadcast %cst_17 : f32 to vector<2x16x512xf32>
    %32 = arith.addf %31, %30 : vector<2x16x512xf32>
    %cst_18 = arith.constant 1.000000e+00 : f32
    %33 = vector.broadcast %cst_18 : f32 to vector<2x16x512xf32>
    %34 = arith.divf %33, %32 : vector<2x16x512xf32>
    %cst_19 = arith.constant 5.000000e-01 : f32
    %35 = vector.broadcast %cst_19 : f32 to vector<2x16x512xf32>
    %36 = arith.cmpf oge, %34, %35 : vector<2x16x512xf32>
    %cst_20 = arith.constant 0.000000e+00 : f32
    %37 = vector.broadcast %cst_20 : f32 to vector<2x16x512xf32>
    %38 = arith.select %36, %0, %37 : vector<2x16x512xi1>, vector<2x16x512xf32>
    %39 = arith.subf %0, %38 : vector<2x16x512xf32>
    %40 = vector.extract_strided_slice %38 {offsets = [0, 0, 0], sizes = [2, 8, 512], strides = [1, 1, 1]} : vector<2x16x512xf32> to vector<2x8x512xf32>
    %41 = vector.extract_strided_slice %39 {offsets = [0, 8, 0], sizes = [2, 8, 512], strides = [1, 1, 1]} : vector<2x16x512xf32> to vector<2x8x512xf32>
    %42 = arith.addf %40, %41 : vector<2x8x512xf32>
    %c0_21 = arith.constant 0 : index
    %c0_22 = arith.constant 0 : index
    %c0_23 = arith.constant 0 : index
    %43 = vector.load %arg5[%c0_21, %c0_22, %c0_23] : memref<2x16x512xf32, #tpu.memory_space<vmem>>, vector<2x8x512xf32>
    tpu.vector_store %arg5[%c0_21, %c0_22, %c0_23], %42 {strides = array<i32>} : memref<2x16x512xf32, #tpu.memory_space<vmem>>, vector<2x8x512xf32>,
    %44 = vector.extract_strided_slice %38 {offsets = [0, 8, 0], sizes = [2, 8, 512], strides = [1, 1, 1]} : vector<2x16x512xf32> to vector<2x8x512xf32>
    %45 = vector.extract_strided_slice %39 {offsets = [0, 0, 0], sizes = [2, 8, 512], strides = [1, 1, 1]} : vector<2x16x512xf32> to vector<2x8x512xf32>
    %46 = arith.addf %44, %45 : vector<2x8x512xf32>
    %c0_24 = arith.constant 0 : index
    %c8 = arith.constant 8 : index
    %c0_25 = arith.constant 0 : index
    %47 = vector.load %arg5[%c0_24, %c8, %c0_25] : memref<2x16x512xf32, #tpu.memory_space<vmem>>, vector<2x8x512xf32>
    tpu.vector_store %arg5[%c0_24, %c8, %c0_25], %46 {strides = array<i32>} : memref<2x16x512xf32, #tpu.memory_space<vmem>>, vector<2x8x512xf32>,
    return
  }
  func.func @transform_0(%arg0: i32) -> (i32, i32, i32) {
    %c0_i32 = arith.constant 0 : i32
    %c0_i32_0 = arith.constant 0 : i32
    %c0_i32_1 = arith.constant 0 : i32
    return %arg0, %c0_i32, %c0_i32_0 : i32, i32, i32
  }
  func.func @transform_1(%arg0: i32) -> (i32, i32, i32) {
    %c0_i32 = arith.constant 0 : i32
    %c0_i32_0 = arith.constant 0 : i32
    %c0_i32_1 = arith.constant 0 : i32
    %c0_i32_2 = arith.constant 0 : i32
    return %c0_i32, %c0_i32_0, %c0_i32_1 : i32, i32, i32
  }
  func.func @transform_2(%arg0: i32) -> (i32, i32, i32) {
    %c0_i32 = arith.constant 0 : i32
    %c0_i32_0 = arith.constant 0 : i32
    %c0_i32_1 = arith.constant 0 : i32
    %c0_i32_2 = arith.constant 0 : i32
    return %c0_i32, %c0_i32_0, %c0_i32_1 : i32, i32, i32
  }
  func.func @transform_3(%arg0: i32) -> (i32, i32, i32) {
    %c0_i32 = arith.constant 0 : i32
    %c0_i32_0 = arith.constant 0 : i32
    %c0_i32_1 = arith.constant 0 : i32
    %c0_i32_2 = arith.constant 0 : i32
    return %c0_i32, %c0_i32_0, %c0_i32_1 : i32, i32, i32
  }
  func.func @transform_4(%arg0: i32) -> (i32, i32, i32) {
    %c0_i32 = arith.constant 0 : i32
    %c0_i32_0 = arith.constant 0 : i32
    %c0_i32_1 = arith.constant 0 : i32
    return %arg0, %c0_i32, %c0_i32_0 : i32, i32, i32
  }
}

</mosaic_0001>

<bundles_post_ra>
// kernel: tpu_custom_call.1
= control target key start
LH: loop header
LB: loop body
LE: loop exit
PB: predicated region body
PF: predicated region fallthrough
CT: control target
= control target key end

     0   :  { %9 = vsyncpa [#allocation3], 0  ;;  %s1091_s0 = inlined_call_operand.hbm [shape: f32[2,16,512], index: 0, kind: input, shape index: {}]   ;;  %s1092_s1 = inlined_call_operand.hbm [shape: f32[1,16,512], index: 1, kind: input, shape index: {}]   ;;  %s1093_s2 = inlined_call_operand.hbm [shape: f32[1,16,512], index: 2, kind: input, shape index: {}]   ;;  %s1094_s3 = inlined_call_operand.hbm [shape: f32[1,16,512], index: 3, kind: input, shape index: {}]   ;;  %s1095_s4 = inlined_call_operand.hbm [shape: f32[2,16,512], index: 4, kind: output, shape index: {}]  }
   0x1   :  { %10 = vsyncpa [#allocation6], 0 }
   0x2   :  { %11 = vsyncpa [#allocation9], 0 }
   0x3   :  { %12 = vsyncpa [#allocation4], 0  ;;  %s698_s15 = smov [#allocation5]   ;;  %s699_s17 = smov [#allocation2]  }
   0x4   :  { %s30_s16 = sshll.u32 %s698_s15, 4  ;;  %s18_s18 = sshll.u32 %s699_s17, 4  ;;  %s31_s16 = int_to_ptr.vmem [resolvable:$true] %s30_s16  ;;  %s730_s18 = int_to_ptr.vmem [resolvable:$true] %s18_s18 }
   0x5   :  { %s580_s21 = scalar_lea.hbm %s1092_s1, 1024 }
   0x6   :  { %p581_p0 = scmp.ne.s32.totalorder %s1092_s1, %s580_s21  ;;  %p584_p1 = scmp.lt.u32.totalorder %s580_s21, %s1092_s1 }
   0x8   :  { %p586_p2 = pnand %p584_p1, %p581_p0 }
   0xa   :  { %589 = shalt.err (!%p586_p2)
}
   0xb   :  { %s590_s26 = scalar_lea.vmem %s31_s16, 1024  ;;  %p595_p4 = scmp.lt.s32.totalorder %s31_s16, %s31_s16 }
   0xc   :  { %p591_p3 = scmp.ne.s32.totalorder %s31_s16, %s590_s26  ;;  %p596_p5 = scmp.lt.s32.totalorder %s590_s26, %s590_s26 }
   0xe   :  { %p597_p6 = por %p596_p5, %p595_p4 }
  0x10   :  { %p598_p7 = pnand %p597_p6, %p591_p3 }
  0x12   :  { %601 = shalt.err (!%p598_p7)
}
  0x13   :  { %s700_s27 = smov 512   ;;  %s701_s28 = smov 32  }
  0x14   :  { %36 = dma.hbm_to_vmem [thread:$0]  %s1092_s1, 1024, %s31_s16, [#allocation6], %s700_s27, %s700_s27, %s701_s28  }
  0x15   :  { %s602_s7 = scalar_lea.hbm %s1091_s0, 2048 }
  0x16   :  { %p603_p8 = scmp.ne.s32.totalorder %s1091_s0, %s602_s7  ;;  %p606_p9 = scmp.lt.u32.totalorder %s602_s7, %s1091_s0 }
  0x18   :  { %p608_p10 = pnand %p606_p9, %p603_p8 }
  0x1a   :  { %611 = shalt.err (!%p608_p10)
}
  0x1b   :  { %s612_s12 = scalar_lea.vmem %s730_s18, 2048  ;;  %p617_p12 = scmp.lt.s32.totalorder %s730_s18, %s730_s18 }
  0x1c   :  { %p613_p11 = scmp.ne.s32.totalorder %s730_s18, %s612_s12  ;;  %p618_p13 = scmp.lt.s32.totalorder %s612_s12, %s612_s12 }
  0x1e   :  { %p619_p0 = por %p618_p13, %p617_p12 }
  0x20   :  { %p620_p1 = pnand %p619_p0, %p613_p11 }
  0x22   :  { %623 = shalt.err (!%p620_p1)
}
  0x23   :  { %24 = dma.hbm_to_vmem [thread:$0]  %s1091_s0, 2048, %s730_s18, [#allocation3], %s700_s27, %s700_s27, %s701_s28  }
  0x24   :  { %s702_s14 = smov [#allocation7]   ;;  %s703_s16 = smov [#allocation8]  }
  0x25   :  { %s42_s15 = sshll.u32 %s702_s14, 4  ;;  %s54_s17 = sshll.u32 %s703_s16, 4  ;;  %s43_s15 = int_to_ptr.vmem [resolvable:$true] %s42_s15  ;;  %s767_s17 = int_to_ptr.vmem [resolvable:$true] %s54_s17 }
  0x26   :  { %s624_s21 = scalar_lea.hbm %s1093_s2, 1024 }
  0x27   :  { %p625_p2 = scmp.ne.s32.totalorder %s1093_s2, %s624_s21  ;;  %p628_p3 = scmp.lt.u32.totalorder %s624_s21, %s1093_s2 }
  0x29   :  { %p630_p4 = pnand %p628_p3, %p625_p2 }
  0x2b   :  { %633 = shalt.err (!%p630_p4)
}
  0x2c   :  { %s634_s0 = scalar_lea.vmem %s43_s15, 1024  ;;  %p639_p6 = scmp.lt.s32.totalorder %s43_s15, %s43_s15 }
  0x2d   :  { %p635_p5 = scmp.ne.s32.totalorder %s43_s15, %s634_s0  ;;  %p640_p7 = scmp.lt.s32.totalorder %s634_s0, %s634_s0 }
  0x2f   :  { %p641_p8 = por %p640_p7, %p639_p6 }
  0x31   :  { %p642_p9 = pnand %p641_p8, %p635_p5 }
  0x33   :  { %645 = shalt.err (!%p642_p9)
}
  0x34   :  { %48 = dma.hbm_to_vmem [thread:$0]  %s1093_s2, 1024, %s43_s15, [#allocation6], %s700_s27, %s700_s27, %s701_s28  }
  0x35   :  { %s646_s5 = scalar_lea.hbm %s1094_s3, 1024 }
  0x36   :  { %p647_p10 = scmp.ne.s32.totalorder %s1094_s3, %s646_s5  ;;  %p650_p11 = scmp.lt.u32.totalorder %s646_s5, %s1094_s3 }
  0x38   :  { %p652_p12 = pnand %p650_p11, %p647_p10 }
  0x3a   :  { %655 = shalt.err (!%p652_p12)
}
  0x3b   :  { %s656_s10 = scalar_lea.vmem %s767_s17, 1024  ;;  %p661_p0 = scmp.lt.s32.totalorder %s767_s17, %s767_s17 }
  0x3c   :  { %p657_p13 = scmp.ne.s32.totalorder %s767_s17, %s656_s10  ;;  %p662_p1 = scmp.lt.s32.totalorder %s656_s10, %s656_s10 }
  0x3e   :  { %p663_p2 = por %p662_p1, %p661_p0 }
  0x40   :  { %p664_p3 = pnand %p663_p2, %p657_p13 }
  0x42   :  { %667 = shalt.err (!%p664_p3)
}
  0x43   :  { %60 = dma.hbm_to_vmem [thread:$0]  %s1094_s3, 1024, %s767_s17, [#allocation9], %s700_s27, %s700_s27, %s701_s28  }
  0x44   :  { %690 = dma.done.wait [#allocation3], 2048  }
  0x45   :  { %691 = vsyncadd [#allocation3], 4294965248 }
  0x46   :  { %692 = dma.done.wait [#allocation6], 2048  }
  0x47   :  { %693 = vsyncadd [#allocation6], 4294965248 }
  0x48   :  { %694 = dma.done.wait [#allocation9], 1024  }
  0x49   :  { %695 = vsyncadd [#allocation9], 4294966272  ;;  %v804_v0 = vld [vmem:[#allocation2 + $0x40] sm:$0xff]  ;;  %v806_v1 = vld [vmem:[#allocation2 + $0x48] sm:$0xff]  ;;  %s704_s3 = smov [#allocation10]  }
  0x4a   :  { %v808_v2 = vld [vmem:[#allocation2 + $0x50] sm:$0xff]  ;;  %v99_v3 = vadd.f32 %v806_v1, %v804_v0  ;;  %v812_v4 = vld [vmem:[#allocation2] sm:$0xff]  ;;  %v814_v5 = vld [vmem:[#allocation2 + $0x8] sm:$0xff]  ;;  %s479_s12 = sshll.u32 %s704_s3, 4  ;;  %s480_s12 = int_to_ptr.vmem [resolvable:$true] %s479_s12 }
  0x4b   :  { %v816_v6 = vld [vmem:[#allocation2 + $0x58] sm:$0xff]  ;;  %v818_v7 = vld [vmem:[#allocation2 + $0x10] sm:$0xff]  ;;  %v89_v8 = vadd.f32 %v814_v5, %v812_v4  ;;  %v822_v9 = vld [vmem:[#allocation2 + $0x60] sm:$0xff]  ;;  %s668_s1 = scalar_lea.vmem %s480_s12, 2048  ;;  %p673_p5 = scmp.lt.s32.totalorder %s480_s12, %s480_s12 }
  0x4c   :  { %1106 = vst [vmem:[#allocation15_spill] sm:$0xff] %v816_v6  ;;  %1107 = vst [vmem:[#allocation16_spill] sm:$0xff] %v822_v9  ;;  %v100_v10 = vadd.f32 %v99_v3, %v808_v2  ;;  %v825_v11 = vld [vmem:[#allocation2 + $0x18] sm:$0xff]  ;;  %v827_v12 = vld [vmem:[#allocation2 + $0x68] sm:$0xff]  ;;  %p669_p4 = scmp.ne.s32.totalorder %s480_s12, %s668_s1  ;;  %p674_p6 = scmp.lt.s32.totalorder %s668_s1, %s668_s1 }
  0x4d   :  { %1108 = vst [vmem:[#allocation17_spill] sm:$0xff] %v827_v12  ;;  %v829_v13 = vld [vmem:[#allocation2 + $0x70] sm:$0xff]  ;;  %v90_v14 = vadd.f32 %v89_v8, %v818_v7  ;;  %v104_v15 = vadd.f32 %v827_v12, %v822_v9  ;;  %v834_v16 = vld [vmem:[#allocation2 + $0x20] sm:$0xff]  ;;  %v836_v17 = vld [vmem:[#allocation2 + $0x28] sm:$0xff] }
  0x4e   :  { %1109 = vst [vmem:[#allocation18_spill] sm:$0xff] %v829_v13  ;;  %v838_v18 = vld [vmem:[#allocation2 + $0x30] sm:$0xff]  ;;  %v101_v19 = vadd.f32 %v100_v10, %v816_v6  ;;  %v841_v20 = vld [vmem:[#allocation2 + $0x78] sm:$0xff]  ;;  %v94_v21 = vadd.f32 %v836_v17, %v834_v16  ;;  %p675_p7 = por %p674_p6, %p673_p5 }
  0x4f   :  { %1110 = vst [vmem:[#allocation19_spill] sm:$0xff] %v841_v20  ;;  %v91_v22 = vadd.f32 %v90_v14, %v825_v11  ;;  %v105_v23 = vadd.f32 %v104_v15, %v829_v13  ;;  %v847_v24 = vld [vmem:[#allocation2 + $0x38] sm:$0xff] }
  0x50   :  { %102 = vadd.xlane.f32.xlu1 %v101_v19  ;;  %v95_v25 = vadd.f32 %v94_v21, %v838_v18  ;;  %p676_p8 = pnand %p675_p7, %p669_p4 }
  0x51   :  { %92 = vadd.xlane.f32.xlu0 %v91_v22  ;;  %v106_v26 = vadd.f32 %v105_v23, %v841_v20 }
  0x52   :  { %v96_v27 = vadd.f32 %v95_v25, %v847_v24 }
  0x54   :  { %107 = vadd.xlane.f32.xlu1 %v106_v26 }
  0x55   :  { %97 = vadd.xlane.f32.xlu0 %v96_v27 }
  0xdd   :  { %v103_v28 = vpop.xlane.xlu1 %102 }
  0xde   :  { %v112_v29 = vmul.f32 0.001953125, %v103_v28  ;;  %v93_v30 = vpop.xlane.xlu0 %92 }
  0xdf   :  { %v110_v31 = vmul.f32 0.001953125, %v93_v30 }
  0xe0   :  { %v853_v32 = vsub.f32 %v804_v0, %v112_v29  ;;  %v856_v33 = vsub.f32 %v806_v1, %v112_v29  ;;  %v859_v34 = vsub.f32 %v808_v2, %v112_v29  ;;  %v871_v39 = vsub.f32 %v816_v6, %v112_v29 }
  0xe1   :  { %v862_v35 = vsub.f32 %v812_v4, %v110_v31  ;;  %v865_v36 = vsub.f32 %v814_v5, %v110_v31  ;;  %v108_v37 = vpop.xlane.xlu1 %107  ;;  %v868_v38 = vsub.f32 %v818_v7, %v110_v31  ;;  %v874_v42 = vsub.f32 %v825_v11, %v110_v31 }
  0xe2   :  { %v113_v40 = vmul.f32 0.001953125, %v108_v37  ;;  %v98_v41 = vpop.xlane.xlu0 %97  ;;  %v138_v43 = vmul.f32 %v853_v32, %v853_v32  ;;  %v139_v44 = vmul.f32 %v856_v33, %v856_v33  ;;  %v140_v51 = vmul.f32 %v859_v34, %v859_v34 }
  0xe3   :  { %v111_v45 = vmul.f32 0.001953125, %v98_v41  ;;  %v130_v46 = vmul.f32 %v862_v35, %v862_v35  ;;  %v131_v47 = vmul.f32 %v865_v36, %v865_v36  ;;  %v132_v50 = vmul.f32 %v868_v38, %v868_v38 }
  0xe4   :  { %v885_v48 = vsub.f32 %v822_v9, %v113_v40  ;;  %v888_v49 = vsub.f32 %v827_v12, %v113_v40  ;;  %v156_v55 = vadd.f32 %v139_v44, %v138_v43  ;;  %v133_v56 = vmul.f32 %v874_v42, %v874_v42 }
  0xe5   :  { %v895_v52 = vsub.f32 %v834_v16, %v111_v45  ;;  %v898_v53 = vsub.f32 %v836_v17, %v111_v45  ;;  %v146_v54 = vadd.f32 %v131_v47, %v130_v46  ;;  %v141_v57 = vmul.f32 %v871_v39, %v871_v39 }
  0xe6   :  { %v905_v58 = vsub.f32 %v838_v18, %v111_v45  ;;  %v908_v59 = vsub.f32 %v829_v13, %v113_v40  ;;  %v911_v61 = vsub.f32 %v847_v24, %v111_v45  ;;  %v157_v3 = vadd.f32 %v156_v55, %v140_v51 }
  0xe7   :  { %v147_v60 = vadd.f32 %v146_v54, %v132_v50  ;;  %v134_v62 = vmul.f32 %v895_v52, %v895_v52  ;;  %v135_v63 = vmul.f32 %v898_v53, %v898_v53  ;;  %v918_v8 = vsub.f32 %v841_v20, %v113_v40  ;;  %v1002_v20 = vld [vmem:[#allocation8 + $0x38] sm:$0xff] }
  0xe8   :  { %v142_v10 = vmul.f32 %v885_v48, %v885_v48  ;;  %v143_v14 = vmul.f32 %v888_v49, %v888_v49  ;;  %v136_v19 = vmul.f32 %v905_v58, %v905_v58  ;;  %v144_v22 = vmul.f32 %v908_v59, %v908_v59 }
  0xe9   :  { %v148_v15 = vadd.f32 %v147_v60, %v133_v56  ;;  %v151_v21 = vadd.f32 %v135_v63, %v134_v62  ;;  %v137_v25 = vmul.f32 %v911_v61, %v911_v61  ;;  %v158_v27 = vadd.f32 %v157_v3, %v141_v57 }
  0xea   :  { %v161_v23 = vadd.f32 %v143_v14, %v142_v10  ;;  %v145_v29 = vmul.f32 %v918_v8, %v918_v8 }
  0xeb   :  { %149 = vadd.xlane.f32.xlu0 %v148_v15  ;;  %v152_v26 = vadd.f32 %v151_v21, %v136_v19 }
  0xec   :  { %v162_v30 = vadd.f32 %v161_v23, %v144_v22 }
  0xed   :  { %v153_v28 = vadd.f32 %v152_v26, %v137_v25 }
  0xee   :  { %v163_v31 = vadd.f32 %v162_v30, %v145_v29 }
  0xef   :  { %159 = vadd.xlane.f32.xlu0 %v158_v27  ;;  %154 = vadd.xlane.f32.xlu1 %v153_v28 }
  0xf3   :  { %164 = vadd.xlane.f32.xlu1 %v163_v31  ;;  %v932_v31 = vld [vmem:[#allocation5] sm:$0xff] }
 0x178   :  { %v150_v37 = vpop.xlane.xlu0 %149 }
 0x179   :  { %v166_v40 = vmul.f32 0.0019569471, %v150_v37 }
 0x17b   :  { %500 = vrsqrt.f32 %v166_v40  ;;  %vm172_vm0 = vcmp.eq.f32.partialorder %v166_v40, inf  ;;  %v175_v54 = vand.u32 2147483648, %v166_v40  ;;  %vm174_vm1 = vcmp.eq.f32.partialorder %v166_v40, 0.0 }
 0x17c   :  { %v155_v41 = vpop.xlane.xlu1 %154  ;;  %v160_v43 = vpop.xlane.xlu0 %159 }
 0x17d   :  { %v167_v44 = vmul.f32 0.0019569471, %v155_v41  ;;  %v168_v45 = vmul.f32 0.0019569471, %v160_v43  ;;  %v936_v41 = vld [vmem:[#allocation5 + $0x10] sm:$0xff]  ;;  %v938_v43 = vld [vmem:[#allocation5 + $0x18] sm:$0xff] }
 0x17f   :  { %502 = vrsqrt.f32 %v167_v44  ;;  %vm179_vm2 = vcmp.eq.f32.partialorder %v167_v44, inf  ;;  %vm181_vm3 = vcmp.eq.f32.partialorder %v167_v44, 0.0  ;;  %v182_v3 = vand.u32 2147483648, %v167_v44 }
 0x180   :  { %504 = vrsqrt.f32 %v168_v45  ;;  %v165_v46 = vpop.xlane.xlu1 %164  ;;  %vm186_vm4 = vcmp.eq.f32.partialorder %v168_v45, inf  ;;  %v189_v15 = vand.u32 2147483648, %v168_v45  ;;  %vm188_vm5 = vcmp.eq.f32.partialorder %v168_v45, 0.0 }
 0x181   :  { %v169_v47 = vmul.f32 0.0019569471, %v165_v46 }
 0x183   :  { %506 = vrsqrt.f32 %v169_v47  ;;  %vm193_vm6 = vcmp.eq.f32.partialorder %v169_v47, inf  ;;  %v196_v29 = vand.u32 2147483648, %v169_v47  ;;  %vm195_vm7 = vcmp.eq.f32.partialorder %v169_v47, 0.0 }
 0x185   :  { %v501_v50 = vpop.eup %500 }
 0x186   :  { %v171_v51 = vmul.f32 %v501_v50, %v166_v40 }
 0x188   :  { %v173_v55 = vsel %vm172_vm0, %v166_v40, %v171_v51  ;;  %v934_v40 = vld [vmem:[#allocation5 + $0x8] sm:$0xff] }
 0x189   :  { %v503_v56 = vpop.eup %502  ;;  %v176_v57 = vsel %vm174_vm1, %v175_v54, %v173_v55  ;;  %v946_v54 = vld [vmem:[#allocation7 + $0x8] sm:$0xff]  ;;  %v948_v55 = vld [vmem:[#allocation7 + $0x10] sm:$0xff] }
 0x18a   :  { %v505_v60 = vpop.eup %504  ;;  %v198_v62 = vadd.f32 1e-10, %v176_v57  ;;  %v178_v63 = vmul.f32 %v503_v56, %v167_v44  ;;  %v950_v56 = vld [vmem:[#allocation7 + $0x18] sm:$0xff]  ;;  %v952_v57 = vld [vmem:[#allocation8] sm:$0xff] }
 0x18b   :  { %v185_v10 = vmul.f32 %v505_v60, %v168_v45  ;;  %v954_v60 = vld [vmem:[#allocation8 + $0x8] sm:$0xff] }
 0x18c   :  { %508 = vrcp.f32 %v198_v62  ;;  %v180_v14 = vsel %vm179_vm2, %v167_v44, %v178_v63 }
 0x18d   :  { %v507_v19 = vpop.eup %506  ;;  %v183_v21 = vsel %vm181_vm3, %v182_v3, %v180_v14  ;;  %v187_v22 = vsel %vm186_vm4, %v168_v45, %v185_v10  ;;  %v940_v45 = vld [vmem:[#allocation7] sm:$0xff]  ;;  %v962_v3 = vld [vmem:[#allocation8 + $0x18] sm:$0xff] }
 0x18e   :  { %v199_v23 = vadd.f32 1e-10, %v183_v21  ;;  %v190_v25 = vsel %vm188_vm5, %v189_v15, %v187_v22  ;;  %v192_v26 = vmul.f32 %v507_v19, %v169_v47  ;;  %v964_v10 = vld [vmem:[#allocation5 + $0x20] sm:$0xff]  ;;  %v970_v22 = vld [vmem:[#allocation5 + $0x28] sm:$0xff] }
 0x18f   :  { %v200_v27 = vadd.f32 1e-10, %v190_v25  ;;  %v974_v25 = vld [vmem:[#allocation5 + $0x38] sm:$0xff] }
 0x190   :  { %510 = vrcp.f32 %v199_v23  ;;  %v194_v28 = vsel %vm193_vm6, %v169_v47, %v192_v26  ;;  %v972_v23 = vld [vmem:[#allocation5 + $0x30] sm:$0xff]  ;;  %v976_v26 = vld [vmem:[#allocation7 + $0x20] sm:$0xff] }
 0x191   :  { %v197_v30 = vsel %vm195_vm7, %v196_v29, %v194_v28  ;;  %512 = vrcp.f32 %v200_v27 }
 0x192   :  { %v201_v44 = vadd.f32 1e-10, %v197_v30 }
 0x194   :  { %514 = vrcp.f32 %v201_v44 }
 0x196   :  { %v509_v37 = vpop.eup %508 }
 0x197   :  { %v210_v46 = vmul.f32 %v509_v37, %v862_v35  ;;  %v211_v50 = vmul.f32 %v509_v37, %v865_v36  ;;  %v212_v47 = vmul.f32 %v509_v37, %v868_v38  ;;  %v213_v51 = vmul.f32 %v509_v37, %v874_v42  ;;  %v960_v42 = vld [vmem:[#allocation8 + $0x10] sm:$0xff] }
 0x199   :  { %v234_v62 = vmul.f32 %v932_v31, %v210_v46  ;;  %v235_v35 = vmul.f32 %v934_v40, %v211_v50  ;;  %v236_v36 = vmul.f32 %v936_v41, %v212_v47  ;;  %v237_v38 = vmul.f32 %v938_v43, %v213_v51  ;;  %v986_v47 = vld [vmem:[#allocation7 + $0x28] sm:$0xff]  ;;  %v988_v51 = vld [vmem:[#allocation7 + $0x30] sm:$0xff] }
 0x19a   :  { %v511_v63 = vpop.eup %510 }
 0x19b   :  { %v258_v14 = vadd.f32 %v940_v45, %v234_v62  ;;  %v259_v15 = vadd.f32 %v946_v54, %v235_v35  ;;  %v260_v19 = vadd.f32 %v948_v55, %v236_v36  ;;  %v261_v21 = vadd.f32 %v950_v56, %v237_v38  ;;  %v990_v62 = vld [vmem:[#allocation7 + $0x38] sm:$0xff] }
 0x19c   :  { %v214_v27 = vmul.f32 %v511_v63, %v895_v52  ;;  %v215_v28 = vmul.f32 %v511_v63, %v898_v53  ;;  %v216_v29 = vmul.f32 %v511_v63, %v905_v58  ;;  %v217_v30 = vmul.f32 %v511_v63, %v911_v61  ;;  %v513_v52 = vpop.eup %512  ;;  %v992_v53 = vld [vmem:[#allocation8 + $0x20] sm:$0xff] }
 0x19d   :  { %v282_v37 = vmul.f32 %v952_v57, %v258_v14  ;;  %v283_v44 = vmul.f32 %v954_v60, %v259_v15  ;;  %v284_v46 = vmul.f32 %v960_v42, %v260_v19  ;;  %v285_v50 = vmul.f32 %v962_v3, %v261_v21  ;;  %v998_v19 = vld [vmem:[#allocation8 + $0x28] sm:$0xff]  ;;  %v1000_v21 = vld [vmem:[#allocation8 + $0x30] sm:$0xff] }
 0x19e   :  { %v238_v58 = vmul.f32 %v964_v10, %v214_v27  ;;  %v239_v61 = vmul.f32 %v970_v22, %v215_v28  ;;  %v240_v35 = vmul.f32 %v972_v23, %v216_v29  ;;  %v241_v36 = vmul.f32 %v974_v25, %v217_v30 }
 0x19f   :  { %v298_v38 = vsub.f32 0.0, %v282_v37  ;;  %v299_v63 = vsub.f32 0.0, %v283_v44  ;;  %v300_v14 = vsub.f32 0.0, %v284_v46  ;;  %v301_v15 = vsub.f32 0.0, %v285_v50 }
 0x1a0   :  { %v262_v13 = vadd.f32 %v976_v26, %v238_v58  ;;  %v263_v27 = vadd.f32 %v986_v47, %v239_v61  ;;  %v264_v28 = vadd.f32 %v988_v51, %v240_v35  ;;  %v265_v29 = vadd.f32 %v990_v62, %v241_v36  ;;  %v515_v36 = vpop.eup %514 }
 0x1a1   :  { %v314_v12 = vmul.f32 1.442695, %v298_v38  ;;  %v316_v30 = vmul.f32 1.442695, %v299_v63  ;;  %v318_v37 = vmul.f32 1.442695, %v300_v14  ;;  %v218_v44 = vmul.f32 %v513_v52, %v853_v32 }
 0x1a2   :  { %v320_v46 = vmul.f32 1.442695, %v301_v15  ;;  %v286_v50 = vmul.f32 %v992_v53, %v262_v13  ;;  %v287_v9 = vmul.f32 %v998_v19, %v263_v27  ;;  %v288_v6 = vmul.f32 %v1000_v21, %v264_v28 }
 0x1a3   :  { %516 = vpow2.f32 %v314_v12  ;;  %v289_v58 = vmul.f32 %v1002_v20, %v265_v29  ;;  %v219_v61 = vmul.f32 %v513_v52, %v856_v33  ;;  %v220_v35 = vmul.f32 %v513_v52, %v859_v34 }
 0x1a4   :  { %518 = vpow2.f32 %v316_v30  ;;  %v302_v38 = vsub.f32 0.0, %v286_v50  ;;  %v303_v63 = vsub.f32 0.0, %v287_v9  ;;  %v304_v14 = vsub.f32 0.0, %v288_v6 }
 0x1a5   :  { %520 = vpow2.f32 %v318_v37  ;;  %v305_v32 = vsub.f32 0.0, %v289_v58  ;;  %v221_v13 = vmul.f32 %v513_v52, %v871_v39  ;;  %v242_v15 = vmul.f32 %v932_v31, %v218_v44 }
 0x1a6   :  { %522 = vpow2.f32 %v320_v46  ;;  %v322_v27 = vmul.f32 1.442695, %v302_v38  ;;  %v324_v12 = vmul.f32 1.442695, %v303_v63  ;;  %v326_v28 = vmul.f32 1.442695, %v304_v14 }
 0x1a7   :  { %v328_v29 = vmul.f32 1.442695, %v305_v32  ;;  %v243_v33 = vmul.f32 %v934_v40, %v219_v61  ;;  %v244_v34 = vmul.f32 %v936_v41, %v220_v35  ;;  %v245_v30 = vmul.f32 %v938_v43, %v221_v13 }
 0x1a8   :  { %524 = vpow2.f32 %v322_v27  ;;  %v266_v6 = vadd.f32 %v940_v45, %v242_v15  ;;  %v222_v9 = vmul.f32 %v515_v36, %v885_v48  ;;  %v223_v39 = vmul.f32 %v515_v36, %v888_v49 }
 0x1a9   :  { %526 = vpow2.f32 %v324_v12  ;;  %v267_v31 = vadd.f32 %v946_v54, %v243_v33  ;;  %v268_v52 = vadd.f32 %v948_v55, %v244_v34  ;;  %v224_v40 = vmul.f32 %v515_v36, %v908_v59 }
 0x1aa   :  { %528 = vpow2.f32 %v326_v28  ;;  %v290_v37 = vmul.f32 %v952_v57, %v266_v6  ;;  %v225_v41 = vmul.f32 %v515_v36, %v918_v8  ;;  %v269_v43 = vadd.f32 %v950_v56, %v245_v30 }
 0x1ab   :  { %530 = vpow2.f32 %v328_v29  ;;  %v291_v45 = vmul.f32 %v954_v60, %v267_v31  ;;  %v246_v49 = vmul.f32 %v964_v10, %v222_v9  ;;  %v247_v44 = vmul.f32 %v970_v22, %v223_v39 }
 0x1ac   :  { %v306_v48 = vsub.f32 0.0, %v290_v37  ;;  %v248_v54 = vmul.f32 %v972_v23, %v224_v40  ;;  %v249_v46 = vmul.f32 %v974_v25, %v225_v41  ;;  %v292_v59 = vmul.f32 %v960_v42, %v268_v52 }
 0x1ad   :  { %v517_v55 = vpop.eup %516  ;;  %v270_v8 = vadd.f32 %v976_v26, %v246_v49  ;;  %v271_v56 = vadd.f32 %v986_v47, %v247_v44  ;;  %v293_v61 = vmul.f32 %v962_v3, %v269_v43  ;;  %v307_v10 = vsub.f32 0.0, %v291_v45 }
 0x1ae   :  { %v519_v57 = vpop.eup %518  ;;  %v346_v50 = vadd.f32 1.0, %v517_v55  ;;  %v272_v22 = vadd.f32 %v988_v51, %v248_v54  ;;  %v330_v36 = vmul.f32 1.442695, %v306_v48  ;;  %v273_v25 = vadd.f32 %v990_v62, %v249_v46 }
 0x1af   :  { %v521_v58 = vpop.eup %520  ;;  %v347_v60 = vadd.f32 1.0, %v519_v57  ;;  %v294_v42 = vmul.f32 %v992_v53, %v270_v8  ;;  %v295_v26 = vmul.f32 %v998_v19, %v271_v56  ;;  %v308_v63 = vsub.f32 0.0, %v292_v59 }
 0x1b0   :  { %v523_v35 = vpop.eup %522  ;;  %v348_v23 = vadd.f32 1.0, %v521_v58  ;;  %532 = vrcp.f32 %v346_v50  ;;  %v296_v3 = vmul.f32 %v1000_v21, %v272_v22  ;;  %v309_v32 = vsub.f32 0.0, %v293_v61 }
 0x1b1   :  { %v349_v38 = vadd.f32 1.0, %v523_v35  ;;  %534 = vrcp.f32 %v347_v60  ;;  %v297_v13 = vmul.f32 %v1002_v20, %v273_v25  ;;  %v310_v62 = vsub.f32 0.0, %v294_v42 }
 0x1b2   :  { %v525_v47 = vpop.eup %524  ;;  %536 = vrcp.f32 %v348_v23  ;;  %v332_v53 = vmul.f32 1.442695, %v307_v10  ;;  %v311_v19 = vsub.f32 0.0, %v295_v26  ;;  %v334_v33 = vmul.f32 1.442695, %v308_v63 }
 0x1b3   :  { %v527_v14 = vpop.eup %526  ;;  %538 = vrcp.f32 %v349_v38  ;;  %v350_v51 = vadd.f32 1.0, %v525_v47  ;;  %v312_v34 = vsub.f32 0.0, %v296_v3  ;;  %v336_v21 = vmul.f32 1.442695, %v309_v32 }
 0x1b4   :  { %v529_v15 = vpop.eup %528  ;;  %v351_v27 = vadd.f32 1.0, %v527_v14  ;;  %540 = vpow2.f32 %v330_v36  ;;  %v313_v30 = vsub.f32 0.0, %v297_v13  ;;  %v338_v6 = vmul.f32 1.442695, %v310_v62 }
 0x1b5   :  { %v531_v12 = vpop.eup %530  ;;  %v352_v28 = vadd.f32 1.0, %v529_v15  ;;  %542 = vrcp.f32 %v350_v51  ;;  %v340_v20 = vmul.f32 1.442695, %v311_v19  ;;  %v342_v39 = vmul.f32 1.442695, %v312_v34 }
 0x1b6   :  { %v353_v29 = vadd.f32 1.0, %v531_v12  ;;  %544 = vrcp.f32 %v351_v27  ;;  %v344_v52 = vmul.f32 1.442695, %v313_v30 }
 0x1b7   :  { %546 = vrcp.f32 %v352_v28 }
 0x1b8   :  { %548 = vrcp.f32 %v353_v29 }
 0x1b9   :  { %550 = vpow2.f32 %v332_v53 }
 0x1ba   :  { %v533_v9 = vpop.eup %532  ;;  %552 = vpow2.f32 %v334_v33 }
 0x1bb   :  { %v535_v31 = vpop.eup %534  ;;  %vm394_vm8 = vcmp.ge.f32.partialorder %v533_v9, 0.5  ;;  %554 = vpow2.f32 %v336_v21 }
 0x1bc   :  { %v537_v37 = vpop.eup %536  ;;  %vm395_vm9 = vcmp.ge.f32.partialorder %v535_v31, 0.5  ;;  %556 = vpow2.f32 %v338_v6  ;;  %v410_v41 = vsel %vm394_vm8, %v812_v4, 0.0  ;;  %v1111_v6 = vld [vmem:[#allocation15_spill] sm:$0xff] }
 0x1bd   :  { %v539_v40 = vpop.eup %538  ;;  %vm396_vm10 = vcmp.ge.f32.partialorder %v537_v37, 0.5  ;;  %v411_v43 = vsel %vm395_vm9, %v814_v5, 0.0  ;;  %558 = vpow2.f32 %v340_v20  ;;  %v426_v46 = vsub.f32 %v812_v4, %v410_v41 }
 0x1be   :  { %v541_v45 = vpop.eup %540  ;;  %vm397_vm11 = vcmp.ge.f32.partialorder %v539_v40, 0.5  ;;  %v412_v48 = vsel %vm396_vm10, %v818_v7, 0.0  ;;  %560 = vpow2.f32 %v342_v39  ;;  %v427_v57 = vsub.f32 %v814_v5, %v411_v43  ;;  %v1112_v40 = vld [vmem:[#allocation16_spill] sm:$0xff] }
 0x1bf   :  { %v543_v49 = vpop.eup %542  ;;  %v413_v44 = vsel %vm397_vm11, %v825_v11, 0.0  ;;  %v354_v54 = vadd.f32 1.0, %v541_v45  ;;  %562 = vpow2.f32 %v344_v52  ;;  %v428_v50 = vsub.f32 %v818_v7, %v412_v48  ;;  %v1113_v45 = vld [vmem:[#allocation17_spill] sm:$0xff] }
 0x1c0   :  { %v545_v55 = vpop.eup %544  ;;  %vm398_vm12 = vcmp.ge.f32.partialorder %v543_v49, 0.5  ;;  %v429_v8 = vsub.f32 %v825_v11, %v413_v44 }
 0x1c1   :  { %v547_v59 = vpop.eup %546  ;;  %vm399_vm13 = vcmp.ge.f32.partialorder %v545_v55, 0.5  ;;  %v414_v56 = vsel %vm398_vm12, %v834_v16, 0.0  ;;  %564 = vrcp.f32 %v354_v54 }
 0x1c2   :  { %v549_v58 = vpop.eup %548  ;;  %vm400_vm14 = vcmp.ge.f32.partialorder %v547_v59, 0.5  ;;  %v415_v60 = vsel %vm399_vm13, %v836_v17, 0.0  ;;  %v430_v61 = vsub.f32 %v834_v16, %v414_v56  ;;  %v458_v10 = vadd.f32 %v426_v46, %v414_v56  ;;  %v1115_v46 = vld [vmem:[#allocation19_spill] sm:$0xff] }
 0x1c3   :  { %v551_v4 = vpop.eup %550  ;;  %vm401_vm15 = vcmp.ge.f32.partialorder %v549_v58, 0.5  ;;  %v416_v5 = vsel %vm400_vm14, %v838_v18, 0.0  ;;  %v431_v7 = vsub.f32 %v836_v17, %v415_v60  ;;  %v459_v22 = vadd.f32 %v427_v57, %v415_v60 }
 0x1c4   :  { %v553_v35 = vpop.eup %552  ;;  %v417_v11 = vsel %vm401_vm15, %v847_v24, 0.0  ;;  %v432_v23 = vsub.f32 %v838_v18, %v416_v5  ;;  %v460_v36 = vadd.f32 %v428_v50, %v416_v5  ;;  %466 = vst [vmem:[#allocation10 + $0x20] sm:$0xff] %v458_v10  ;;  %v355_v25 = vadd.f32 1.0, %v551_v4 }
 0x1c5   :  { %v555_v38 = vpop.eup %554  ;;  %v433_v42 = vsub.f32 %v847_v24, %v417_v11  ;;  %v461_v16 = vadd.f32 %v429_v8, %v417_v11  ;;  %467 = vst [vmem:[#allocation10 + $0x28] sm:$0xff] %v459_v22  ;;  %v356_v26 = vadd.f32 1.0, %v553_v35  ;;  %v442_v47 = vadd.f32 %v430_v61, %v410_v41 }
 0x1c6   :  { %v557_v63 = vpop.eup %556  ;;  %468 = vst [vmem:[#allocation10 + $0x30] sm:$0xff] %v460_v36  ;;  %v357_v3 = vadd.f32 1.0, %v555_v38  ;;  %566 = vrcp.f32 %v355_v25  ;;  %v443_v17 = vadd.f32 %v431_v7, %v411_v43  ;;  %v444_v14 = vadd.f32 %v432_v23, %v412_v48 }
 0x1c7   :  { %v559_v51 = vpop.eup %558  ;;  %469 = vst [vmem:[#allocation10 + $0x38] sm:$0xff] %v461_v16  ;;  %568 = vrcp.f32 %v356_v26  ;;  %v358_v18 = vadd.f32 1.0, %v557_v63  ;;  %v445_v32 = vadd.f32 %v433_v42, %v413_v44  ;;  %450 = vst [vmem:[#allocation10] sm:$0xff] %v442_v47 }
 0x1c8   :  { %v561_v13 = vpop.eup %560  ;;  %570 = vrcp.f32 %v357_v3  ;;  %v359_v15 = vadd.f32 1.0, %v559_v51  ;;  %451 = vst [vmem:[#allocation10 + $0x8] sm:$0xff] %v443_v17  ;;  %452 = vst [vmem:[#allocation10 + $0x10] sm:$0xff] %v444_v14 }
 0x1c9   :  { %v563_v24 = vpop.eup %562  ;;  %v360_v27 = vadd.f32 1.0, %v561_v13  ;;  %572 = vrcp.f32 %v358_v18  ;;  %453 = vst [vmem:[#allocation10 + $0x18] sm:$0xff] %v445_v32 }
 0x1ca   :  { %v361_v62 = vadd.f32 1.0, %v563_v24  ;;  %574 = vrcp.f32 %v359_v15 }
 0x1cb   :  { %v565_v12 = vpop.eup %564  ;;  %576 = vrcp.f32 %v360_v27 }
 0x1cc   :  { %578 = vrcp.f32 %v361_v62  ;;  %vm402_vm0 = vcmp.ge.f32.partialorder %v565_v12, 0.5 }
 0x1cd   :  { %v418_v19 = vsel %vm402_vm0, %v804_v0, 0.0 }
 0x1ce   :  { %v434_v9 = vsub.f32 %v804_v0, %v418_v19  ;;  %v1114_v0 = vld [vmem:[#allocation18_spill] sm:$0xff] }
 0x1d0   :  { %v567_v28 = vpop.eup %566 }
 0x1d1   :  { %v569_v53 = vpop.eup %568  ;;  %vm403_vm1 = vcmp.ge.f32.partialorder %v567_v28, 0.5 }
 0x1d2   :  { %v571_v29 = vpop.eup %570  ;;  %vm404_vm2 = vcmp.ge.f32.partialorder %v569_v53, 0.5  ;;  %v419_v33 = vsel %vm403_vm1, %v806_v1, 0.0 }
 0x1d3   :  { %v573_v34 = vpop.eup %572  ;;  %vm405_vm3 = vcmp.ge.f32.partialorder %v571_v29, 0.5  ;;  %v420_v21 = vsel %vm404_vm2, %v808_v2, 0.0  ;;  %v435_v39 = vsub.f32 %v806_v1, %v419_v33 }
 0x1d4   :  { %v575_v30 = vpop.eup %574  ;;  %v421_v20 = vsel %vm405_vm3, %v1111_v6, 0.0  ;;  %vm406_vm4 = vcmp.ge.f32.partialorder %v573_v34, 0.5  ;;  %v436_v52 = vsub.f32 %v808_v2, %v420_v21 }
 0x1d5   :  { %v577_v31 = vpop.eup %576  ;;  %v437_v37 = vsub.f32 %v1111_v6, %v421_v20  ;;  %vm407_vm5 = vcmp.ge.f32.partialorder %v575_v30, 0.5  ;;  %v422_v41 = vsel %vm406_vm4, %v1112_v40, 0.0 }
 0x1d6   :  { %v579_v43 = vpop.eup %578  ;;  %vm408_vm6 = vcmp.ge.f32.partialorder %v577_v31, 0.5  ;;  %v423_v48 = vsel %vm407_vm5, %v1113_v45, 0.0  ;;  %v438_v49 = vsub.f32 %v1112_v40, %v422_v41  ;;  %v462_v44 = vadd.f32 %v434_v9, %v422_v41 }
 0x1d7   :  { %vm409_vm7 = vcmp.ge.f32.partialorder %v579_v43, 0.5  ;;  %v424_v54 = vsel %vm408_vm6, %v1114_v0, 0.0  ;;  %v439_v1 = vsub.f32 %v1113_v45, %v423_v48  ;;  %v463_v55 = vadd.f32 %v435_v39, %v423_v48 }
 0x1d8   :  { %v425_v2 = vsel %vm409_vm7, %v1115_v46, 0.0  ;;  %v440_v57 = vsub.f32 %v1114_v0, %v424_v54  ;;  %v446_v50 = vadd.f32 %v438_v49, %v418_v19  ;;  %v464_v59 = vadd.f32 %v436_v52, %v424_v54  ;;  %470 = vst [vmem:[#allocation10 + $0x60] sm:$0xff] %v462_v44 }
 0x1d9   :  { %v441_v8 = vsub.f32 %v1115_v46, %v425_v2  ;;  %v447_v56 = vadd.f32 %v439_v1, %v419_v33  ;;  %v465_v58 = vadd.f32 %v437_v37, %v425_v2  ;;  %471 = vst [vmem:[#allocation10 + $0x68] sm:$0xff] %v463_v55 }
 0x1da   :  { %v448_v60 = vadd.f32 %v440_v57, %v420_v21  ;;  %454 = vst [vmem:[#allocation10 + $0x40] sm:$0xff] %v446_v50  ;;  %472 = vst [vmem:[#allocation10 + $0x70] sm:$0xff] %v464_v59 }
 0x1db   :  { %v449_v61 = vadd.f32 %v441_v8, %v421_v20  ;;  %455 = vst [vmem:[#allocation10 + $0x48] sm:$0xff] %v447_v56  ;;  %473 = vst [vmem:[#allocation10 + $0x78] sm:$0xff] %v465_v58 }
 0x1dc   :  { %456 = vst [vmem:[#allocation10 + $0x50] sm:$0xff] %v448_v60 }
 0x1dd   :  { %457 = vst [vmem:[#allocation10 + $0x58] sm:$0xff] %v449_v61 }
 0x1de   :  { %679 = shalt.err (!%p676_p8)
}
 0x1df   :  { %s680_s15 = scalar_lea.hbm %s1095_s4, 2048 }
 0x1e0   :  { %p681_p9 = scmp.ne.s32.totalorder %s1095_s4, %s680_s15  ;;  %p684_p10 = scmp.lt.u32.totalorder %s680_s15, %s1095_s4 }
 0x1e2   :  { %p686_p11 = pnand %p684_p10, %p681_p9 }
 0x1e4   :  { %689 = shalt.err (!%p686_p11)
}
 0x1e5   :  { %485 = dma.vmem_to_hbm [thread:$0]  %s480_s12, 2048, %s1095_s4, [#allocation4], %s700_s27, %s700_s27, %s701_s28  }
 0x1e6   :  { %696 = dma.done.wait [#allocation4], 2048  }
 0x1e7   :  { %697 = vsyncadd [#allocation4], 4294965248 }
 0x1e8   :  { %489 = vsyncpa [#allocation3], 1 }
 0x1e9   :  { %490 = vsyncpa [#allocation6], 1 }
 0x1ea   :  { %491 = vsyncpa [#allocation9], 1 }
 0x1eb   :  { %492 = vsyncpa [#allocation4], 1 }

</bundles_post_ra>
